<compile_context>
chip_gen: v6e
topology: v6e:2x2x1
jax: 0.10.0
libtpu: 0.0.40
codegen_flags: <defaults>
</compile_context>

<pallas_src>
import functools

import jax
import jax.numpy as jnp
from jax.experimental import pallas as pl
from jax.experimental.pallas import tpu as pltpu

_ROW_TILE = 512                     # row / contraction tile (multiple of 8 and 128)
_LANE = 128                         # feature-dim padding granularity
_VMEM_LIMIT = 32 * 1024 * 1024      # explicit scoped-VMEM budget (safe on v5e/v6e/v7x)


def _round_up(x, m):
    return (x + m - 1) // m * m


# ----------------------------- Pallas kernels ------------------------------


def linear_relu_kernel(x_ref, w_ref, b_ref, o_ref):
    # x: [tm, Fin_p] f32, w: [Fin_p, Fout_p] f32 (resident), b: [1, Fout_p] f32
    y = jnp.dot(x_ref[...], w_ref[...], preferred_element_type=jnp.float32)
    y = y + b_ref[...]
    o_ref[...] = jnp.maximum(y, 0.0).astype(o_ref.dtype)


def appnp_step_kernel(a_ref, h_ref, x0_ref, o_ref, acc_ref, *, alpha):
    # One PPR step, tiled:  o = (1-alpha) * (A @ h) + alpha * x0
    # a: [tm, tk] bf16, h: [tk, Fp] f32 (cast to bf16 at the dot),
    # x0/o: [tm, Fp] f32, acc scratch: [tm, Fp] f32.
    k = pl.program_id(1)

    @pl.when(k == 0)
    def _():
        acc_ref[...] = jnp.zeros_like(acc_ref)

    acc_ref[...] += jnp.dot(
        a_ref[...],
        h_ref[...].astype(jnp.bfloat16),
        preferred_element_type=jnp.float32,
    )

    @pl.when(k == pl.num_programs(1) - 1)
    def _():
        # axpy in f32 (VPU has no bf16 on v5e; f32 keeps precision on all gens)
        o_ref[...] = ((1.0 - alpha) * acc_ref[...] + alpha * x0_ref[...]).astype(
            o_ref.dtype
        )


# ----------------------------- wrappers -------------------------------------


def linear_relu(x, w, b, *, tm=_ROW_TILE):
    """x: [Np, Fin_p] f32, w: [Fin_p, Fout_p] f32, b: [1, Fout_p] f32 (all padded)."""
    n_rows, fin = x.shape
    fout = w.shape[1]
    tm = min(tm, n_rows)
    grid = (n_rows // tm,)
    return pl.pallas_call(
        linear_relu_kernel,
        out_shape=jax.ShapeDtypeStruct((n_rows, fout), x.dtype),
        grid_spec=pltpu.PrefetchScalarGridSpec(
            num_scalar_prefetch=0,
            grid=grid,
            in_specs=[
                pl.BlockSpec((tm, fin), lambda i: (i, 0)),
                pl.BlockSpec((fin, fout), lambda i: (0, 0)),   # resident weights
                pl.BlockSpec((1, fout), lambda i: (0, 0)),     # resident bias
            ],
            out_specs=pl.BlockSpec((tm, fout), lambda i: (i, 0)),
        ),
        compiler_params=pltpu.CompilerParams(
            dimension_semantics=("parallel",),
            vmem_limit_bytes=_VMEM_LIMIT,
        ),
    )(x, w, b)


def appnp_propagate(a_hat, x0, K, alpha, *, tile=_ROW_TILE):
    """K steps of  h <- (1-alpha) * A_hat @ h + alpha * x0 (all padded shapes).

    a_hat: [Np, Np] bfloat16, x0: [Np, Fp] float32.
    """
    n_pad, f_pad = x0.shape
    tm = tk = min(tile, n_pad)
    grid = (n_pad // tm, n_pad // tk)   # reduction (contraction) axis last

    step = pl.pallas_call(
        functools.partial(appnp_step_kernel, alpha=float(alpha)),
        out_shape=jax.ShapeDtypeStruct((n_pad, f_pad), jnp.float32),
        grid_spec=pltpu.PrefetchScalarGridSpec(
            num_scalar_prefetch=0,
            grid=grid,
            in_specs=[
                pl.BlockSpec((tm, tk), lambda i, k: (i, k)),    # A tile
                pl.BlockSpec((tk, f_pad), lambda i, k: (k, 0)),  # h tile
                pl.BlockSpec((tm, f_pad), lambda i, k: (i, 0)),  # x0 tile
            ],
            out_specs=pl.BlockSpec((tm, f_pad), lambda i, k: (i, 0)),
            scratch_shapes=[pltpu.VMEM((tm, f_pad), jnp.float32)],
        ),
        compiler_params=pltpu.CompilerParams(
            dimension_semantics=("parallel", "arbitrary"),
            vmem_limit_bytes=_VMEM_LIMIT,
        ),
    )

    h = x0
    for _ in range(K):   # K is a tiny static constant -> unrolled at trace time
        h = step(a_hat, h, x0)
    return h


# ----------------------------- glue (plain JAX) ------------------------------


def gcn_norm_dense(edge_index, num_nodes, n_pad, dtype=jnp.bfloat16):
    """Dense, zero-padded A_hat = D^{-1/2} (A + I) D^{-1/2}, A_hat[target, source]."""
    src = edge_index[0]
    dst = edge_index[1]
    loop = jnp.arange(num_nodes, dtype=edge_index.dtype)
    src = jnp.concatenate([src, loop])
    dst = jnp.concatenate([dst, loop])
    A = jnp.zeros((num_nodes, num_nodes), jnp.float32).at[dst, src].add(1.0)
    deg = A.sum(axis=1)
    dinv = jnp.where(deg > 0, jax.lax.rsqrt(deg), 0.0)
    A = dinv[:, None] * A * dinv[None, :]
    A = jnp.pad(A, ((0, n_pad - num_nodes), (0, n_pad - num_nodes)))
    return A.astype(dtype)   # bf16 adjacency: halves HBM/VMEM bytes, MXU-native


class APPNPPallas:
    """Inference-mode APPNP: dropout(p=0.5) is the identity when not training."""

    def __init__(self, nfeat, nhid, nclass, K=2, alpha=0.1, dropout=0.5, key=None):
        self.K = K
        self.alpha = alpha
        self.dropout = dropout   # eval mode: identity
        self.nfeat = nfeat
        self.nclass = nclass
        dims = [nfeat] + list(nhid) + [nclass]
        self.weights = []   # padded [Fin_p, Fout_p], i.e. PyTorch W^T zero-padded
        self.biases = []    # padded [1, Fout_p]
        key = key if key is not None else jax.random.PRNGKey(0)
        for i in range(len(dims) - 1):
            key, kw, kb = jax.random.split(key, 3)
            fan_in, fan_out = dims[i], dims[i + 1]
            bound = 1.0 / jnp.sqrt(jnp.float32(fan_in))
            w = jax.random.uniform(kw, (fan_in, fan_out), jnp.float32, -bound, bound)
            b = jax.random.uniform(kb, (fan_out,), jnp.float32, -bound, bound)
            fin_p = _round_up(fan_in, _LANE)
            fout_p = _round_up(fan_out, _LANE)
            w_p = jnp.zeros((fin_p, fout_p), jnp.float32).at[:fan_in, :fan_out].set(w)
            b_p = jnp.zeros((1, fout_p), jnp.float32).at[0, :fan_out].set(b)
            self.weights.append(w_p)
            self.biases.append(b_p)

    def __call__(self, x, edge_index):
        n, f = x.shape
        n_pad = _round_up(n, _ROW_TILE)
        f_pad = _round_up(f, _LANE)
        # zero-pad rows/features once; padded rows/cols never influence real rows
        xp = jnp.zeros((n_pad, f_pad), jnp.float32).at[:n, :f].set(x)

        for w, b in zip(self.weights, self.biases):
            xp = linear_relu(xp, w, b)       # (eval dropout) -> linear -> relu

        a_hat = gcn_norm_dense(edge_index, n, n_pad)   # bf16, padded
        h = appnp_propagate(a_hat, xp, self.K, self.alpha)
        return h[:n, : self.nclass]


# ----------------------------- demo -----------------------------------------

if __name__ == "__main__":
    key = jax.random.PRNGKey(0)
    N, E = 16, 40                      # nodes, edges
    nfeat, nhid, nclass = 8, [32, 16], 4

    k_x, k_e, k_p = jax.random.split(key, 3)
    x = jax.random.normal(k_x, (N, nfeat), jnp.float32)
    edge_index = jax.random.randint(k_e, (2, E), 0, N, jnp.int32)

    model = APPNPPallas(nfeat, nhid, nclass, K=2, alpha=0.1, key=k_p)
    out = model(x, edge_index)
    out = jax.block_until_ready(out)

    assert out.shape == (N, nclass), out.shape
    assert bool(jnp.all(jnp.isfinite(out)))
    print("KERNEL_OK")
</pallas_src>

<mosaic_0001>
module attributes {stable_mosaic.version = 11 : i64} {
  func.func @linear_relu_kernel(%arg0: i32, %arg1: memref<512x128xf32, #tpu.memory_space<vmem>>, %arg2: memref<128x128xf32, #tpu.memory_space<vmem>>, %arg3: memref<1x128xf32, #tpu.memory_space<vmem>>, %arg4: memref<512x128xf32, #tpu.memory_space<vmem>>) attributes {dimension_semantics = [#tpu.dimension_semantics<parallel>], iteration_bounds = array<i64: 1>, scalar_prefetch = 0 : i64, scratch_operands = 0 : i64, tpu.core_type = #tpu.core_type<tc>, window_params = [{transform_indices = @transform_0, window_bounds = array<i64: 512, 128>}, {pipeline_mode = #tpu.pipeline_mode<synchronous>, transform_indices = @transform_1, window_bounds = array<i64: 128, 128>}, {pipeline_mode = #tpu.pipeline_mode<synchronous>, transform_indices = @transform_2, window_bounds = array<i64: 1, 128>}, {transform_indices = @transform_3, window_bounds = array<i64: 512, 128>}]} {
    %c0 = arith.constant 0 : index
    %c0_0 = arith.constant 0 : index
    %0 = vector.load %arg1[%c0, %c0_0] : memref<512x128xf32, #tpu.memory_space<vmem>>, vector<512x128xf32>
    %c0_1 = arith.constant 0 : index
    %c0_2 = arith.constant 0 : index
    %1 = vector.load %arg2[%c0_1, %c0_2] : memref<128x128xf32, #tpu.memory_space<vmem>>, vector<128x128xf32>
    %cst = arith.constant dense<0.000000e+00> : vector<512x128xf32>
    %2 = tpu.matmul %0, %1, %cst {dimension_numbers = #tpu.dot_dimension_numbers<[1], [0], [0], [1], [0, 0, 1, 1], [], []>} : vector<512x128xf32>, vector<128x128xf32>, vector<512x128xf32> -> vector<512x128xf32>
    %c0_3 = arith.constant 0 : index
    %c0_4 = arith.constant 0 : index
    %3 = vector.load %arg3[%c0_3, %c0_4] : memref<1x128xf32, #tpu.memory_space<vmem>>, vector<1x128xf32>
    %4 = vector.broadcast %3 : vector<1x128xf32> to vector<512x128xf32>
    %5 = arith.addf %2, %4 : vector<512x128xf32>
    %cst_5 = arith.constant 0.000000e+00 : f32
    %6 = vector.broadcast %cst_5 : f32 to vector<512x128xf32>
    %7 = arith.maximumf %5, %6 : vector<512x128xf32>
    %c0_6 = arith.constant 0 : index
    %c0_7 = arith.constant 0 : index
    %8 = vector.load %arg4[%c0_6, %c0_7] : memref<512x128xf32, #tpu.memory_space<vmem>>, vector<512x128xf32>
    tpu.vector_store %arg4[%c0_6, %c0_7], %7 {strides = array<i32>} : memref<512x128xf32, #tpu.memory_space<vmem>>, vector<512x128xf32>,
    return
  }
  func.func @transform_0(%arg0: i32) -> (i32, i32) {
    %c0_i32 = arith.constant 0 : i32
    %c0_i32_0 = arith.constant 0 : i32
    return %arg0, %c0_i32 : i32, i32
  }
  func.func @transform_1(%arg0: i32) -> (i32, i32) {
    %c0_i32 = arith.constant 0 : i32
    %c0_i32_0 = arith.constant 0 : i32
    %c0_i32_1 = arith.constant 0 : i32
    return %c0_i32, %c0_i32_0 : i32, i32
  }
  func.func @transform_2(%arg0: i32) -> (i32, i32) {
    %c0_i32 = arith.constant 0 : i32
    %c0_i32_0 = arith.constant 0 : i32
    %c0_i32_1 = arith.constant 0 : i32
    return %c0_i32, %c0_i32_0 : i32, i32
  }
  func.func @transform_3(%arg0: i32) -> (i32, i32) {
    %c0_i32 = arith.constant 0 : i32
    %c0_i32_0 = arith.constant 0 : i32
    return %arg0, %c0_i32 : i32, i32
  }
}

</mosaic_0001>

<bundles_post_ra>
// kernel: tpu_custom_call.1
= control target key start
LH: loop header
LB: loop body
LE: loop exit
PB: predicated region body
PF: predicated region fallthrough
CT: control target
= control target key end

     0   :  { %8 = vsyncpa [#allocation3], 0  ;;  %s1085_s0 = inlined_call_operand.hbm [shape: f32[512,128], index: 0, kind: input, shape index: {}]   ;;  %s1086_s1 = inlined_call_operand.hbm [shape: f32[128,128], index: 1, kind: input, shape index: {}]   ;;  %s1087_s2 = inlined_call_operand.vmem [shape: f32[1,128], index: 2, kind: input, shape index: {}]   ;;  %s1088_s3 = inlined_call_operand.hbm [shape: f32[512,128], index: 3, kind: output, shape index: {}]  }
   0x1   :  { %9 = vsyncpa [#allocation6], 0 }
   0x2   :  { %10 = vsyncpa [#allocation4], 0  ;;  %s973_s12 = smov [#allocation2]  }
   0x3   :  { %s16_s13 = sshll.u32 %s973_s12, 4  ;;  %s17_s13 = int_to_ptr.vmem [resolvable:$true] %s16_s13 }
   0x4   :  { %s915_s14 = scalar_lea.vmem %s17_s13, 8192  ;;  %p920_p1 = scmp.lt.s32.totalorder %s17_s13, %s17_s13 }
   0x5   :  { %p916_p0 = scmp.ne.s32.totalorder %s17_s13, %s915_s14  ;;  %p921_p2 = scmp.lt.s32.totalorder %s915_s14, %s915_s14 }
   0x7   :  { %p922_p3 = por %p921_p2, %p920_p1 }
   0x9   :  { %p923_p4 = pnand %p922_p3, %p916_p0 }
   0xb   :  { %926 = shalt.err (!%p923_p4)
}
   0xc   :  { %s974_s15 = smov 128   ;;  %s975_s16 = smov 8  }
   0xd   :  { %22 = dma.hbm_to_vmem [thread:$0]  %s1085_s0, 8192, %s17_s13, [#allocation3], %s974_s15, %s974_s15, %s975_s16  }
   0xe   :  { %s976_s19 = smov [#allocation5]  }
   0xf   :  { %s28_s20 = sshll.u32 %s976_s19, 4  ;;  %s29_s20 = int_to_ptr.vmem [resolvable:$true] %s28_s20 }
  0x10   :  { %s935_s21 = scalar_lea.vmem %s29_s20, 2048  ;;  %p940_p6 = scmp.lt.s32.totalorder %s29_s20, %s29_s20 }
  0x11   :  { %p936_p5 = scmp.ne.s32.totalorder %s29_s20, %s935_s21  ;;  %p941_p7 = scmp.lt.s32.totalorder %s935_s21, %s935_s21 }
  0x13   :  { %p942_p8 = por %p941_p7, %p940_p6 }
  0x15   :  { %p943_p9 = pnand %p942_p8, %p936_p5 }
  0x17   :  { %946 = shalt.err (!%p943_p9)
}
  0x18   :  { %34 = dma.hbm_to_vmem [thread:$0]  %s1086_s1, 2048, %s29_s20, [#allocation6], %s974_s15, %s974_s15, %s975_s16  }
  0x19   :  { %967 = dma.done.wait [#allocation3], 8192  }
  0x1a   :  { %968 = vsyncadd [#allocation3], 4294959104 }
  0x1b   :  { %969 = dma.done.wait [#allocation6], 2048  }
  0x1c   :  { %970 = vsyncadd [#allocation6], 4294965248  ;;  %v122_v0 = vld [vmem:[#allocation5 + $0x78] sm:$0xff]  ;;  %v121_v1 = vld [vmem:[#allocation5 + $0x70] sm:$0xff] }
  0x1d   :  { %742 = vmatprep.subr.mxu0 %v122_v0  ;;  %870 = vmatprep.subr.mxu1 %v122_v0  ;;  %v120_v2 = vld [vmem:[#allocation5 + $0x68] sm:$0xff]  ;;  %v119_v3 = vld [vmem:[#allocation5 + $0x60] sm:$0xff]  ;;  %v118_v4 = vld [vmem:[#allocation5 + $0x58] sm:$0xff] }
  0x1e   :  { %743 = vmatpush3.msra.mxu0 %v122_v0  ;;  %886 = vmatpush3.msra.mxu1 %v122_v0  ;;  %v117_v5 = vld [vmem:[#allocation5 + $0x50] sm:$0xff]  ;;  %v116_v6 = vld [vmem:[#allocation5 + $0x48] sm:$0xff]  ;;  %v115_v7 = vld [vmem:[#allocation5 + $0x40] sm:$0xff] }
  0x1f   :  { %744 = vmatprep.subr.mxu0 %v121_v1  ;;  %871 = vmatprep.subr.mxu1 %v121_v1  ;;  %v114_v8 = vld [vmem:[#allocation5 + $0x38] sm:$0xff]  ;;  %v113_v9 = vld [vmem:[#allocation5 + $0x30] sm:$0xff]  ;;  %v112_v10 = vld [vmem:[#allocation5 + $0x28] sm:$0xff] }
  0x20   :  { %745 = vmatpush3.msra.mxu0 %v121_v1  ;;  %887 = vmatpush3.msra.mxu1 %v121_v1  ;;  %v111_v11 = vld [vmem:[#allocation5 + $0x20] sm:$0xff]  ;;  %v110_v12 = vld [vmem:[#allocation5 + $0x18] sm:$0xff]  ;;  %v109_v13 = vld [vmem:[#allocation5 + $0x10] sm:$0xff] }
  0x21   :  { %746 = vmatprep.subr.mxu0 %v120_v2  ;;  %872 = vmatprep.subr.mxu1 %v120_v2  ;;  %v108_v14 = vld [vmem:[#allocation5 + $0x8] sm:$0xff]  ;;  %v107_v15 = vld [vmem:[#allocation5] sm:$0xff]  ;;  %v45_v20 = vld [vmem:[#allocation2 + $0x10] sm:$0xff] }
  0x22   :  { %747 = vmatpush3.msra.mxu0 %v120_v2  ;;  %888 = vmatpush3.msra.mxu1 %v120_v2  ;;  %v43_v16 = vld [vmem:[#allocation2] sm:$0xff]  ;;  %v44_v18 = vld [vmem:[#allocation2 + $0x8] sm:$0xff]  ;;  %v77_v21 = vld [vmem:[#allocation2 + $0x110] sm:$0xff] }
  0x23   :  { %748 = vmatprep.subr.mxu0 %v119_v3  ;;  %873 = vmatprep.subr.mxu1 %v119_v3  ;;  %v75_v17 = vld [vmem:[#allocation2 + $0x100] sm:$0xff]  ;;  %v76_v19 = vld [vmem:[#allocation2 + $0x108] sm:$0xff]  ;;  %v46_v22 = vld [vmem:[#allocation2 + $0x18] sm:$0xff] }
  0x24   :  { %749 = vmatpush3.msra.mxu0 %v119_v3  ;;  %889 = vmatpush3.msra.mxu1 %v119_v3  ;;  %v78_v23 = vld [vmem:[#allocation2 + $0x118] sm:$0xff]  ;;  %v47_v24 = vld [vmem:[#allocation2 + $0x20] sm:$0xff]  ;;  %v48_v26 = vld [vmem:[#allocation2 + $0x28] sm:$0xff] }
  0x25   :  { %750 = vmatprep.subr.mxu0 %v118_v4  ;;  %874 = vmatprep.subr.mxu1 %v118_v4  ;;  %v79_v25 = vld [vmem:[#allocation2 + $0x120] sm:$0xff]  ;;  %v80_v27 = vld [vmem:[#allocation2 + $0x128] sm:$0xff]  ;;  %v49_v28 = vld [vmem:[#allocation2 + $0x30] sm:$0xff] }
  0x26   :  { %751 = vmatpush3.msra.mxu0 %v118_v4  ;;  %890 = vmatpush3.msra.mxu1 %v118_v4  ;;  %v81_v29 = vld [vmem:[#allocation2 + $0x130] sm:$0xff]  ;;  %v50_v30 = vld [vmem:[#allocation2 + $0x38] sm:$0xff]  ;;  %v51_v32 = vld [vmem:[#allocation2 + $0x40] sm:$0xff] }
  0x27   :  { %752 = vmatprep.subr.mxu0 %v117_v5  ;;  %875 = vmatprep.subr.mxu1 %v117_v5  ;;  %v82_v31 = vld [vmem:[#allocation2 + $0x138] sm:$0xff]  ;;  %v83_v33 = vld [vmem:[#allocation2 + $0x140] sm:$0xff]  ;;  %v52_v34 = vld [vmem:[#allocation2 + $0x48] sm:$0xff] }
  0x28   :  { %753 = vmatpush3.msra.mxu0 %v117_v5  ;;  %891 = vmatpush3.msra.mxu1 %v117_v5  ;;  %v84_v35 = vld [vmem:[#allocation2 + $0x148] sm:$0xff]  ;;  %v53_v36 = vld [vmem:[#allocation2 + $0x50] sm:$0xff]  ;;  %v54_v38 = vld [vmem:[#allocation2 + $0x58] sm:$0xff] }
  0x29   :  { %754 = vmatprep.subr.mxu0 %v116_v6  ;;  %876 = vmatprep.subr.mxu1 %v116_v6  ;;  %v85_v37 = vld [vmem:[#allocation2 + $0x150] sm:$0xff]  ;;  %v86_v39 = vld [vmem:[#allocation2 + $0x158] sm:$0xff]  ;;  %v55_v40 = vld [vmem:[#allocation2 + $0x60] sm:$0xff] }
  0x2a   :  { %755 = vmatpush3.msra.mxu0 %v116_v6  ;;  %892 = vmatpush3.msra.mxu1 %v116_v6  ;;  %v87_v41 = vld [vmem:[#allocation2 + $0x160] sm:$0xff]  ;;  %v56_v42 = vld [vmem:[#allocation2 + $0x68] sm:$0xff]  ;;  %v57_v44 = vld [vmem:[#allocation2 + $0x70] sm:$0xff] }
  0x2b   :  { %756 = vmatprep.subr.mxu0 %v115_v7  ;;  %877 = vmatprep.subr.mxu1 %v115_v7  ;;  %v88_v43 = vld [vmem:[#allocation2 + $0x168] sm:$0xff]  ;;  %v89_v45 = vld [vmem:[#allocation2 + $0x170] sm:$0xff]  ;;  %v58_v46 = vld [vmem:[#allocation2 + $0x78] sm:$0xff] }
  0x2c   :  { %757 = vmatpush3.msra.mxu0 %v115_v7  ;;  %893 = vmatpush3.msra.mxu1 %v115_v7  ;;  %v90_v47 = vld [vmem:[#allocation2 + $0x178] sm:$0xff]  ;;  %v59_v48 = vld [vmem:[#allocation2 + $0x80] sm:$0xff]  ;;  %v60_v50 = vld [vmem:[#allocation2 + $0x88] sm:$0xff] }
  0x2d   :  { %758 = vmatprep.subr.mxu0 %v114_v8  ;;  %878 = vmatprep.subr.mxu1 %v114_v8  ;;  %v91_v49 = vld [vmem:[#allocation2 + $0x180] sm:$0xff]  ;;  %v92_v51 = vld [vmem:[#allocation2 + $0x188] sm:$0xff]  ;;  %v61_v52 = vld [vmem:[#allocation2 + $0x90] sm:$0xff] }
  0x2e   :  { %759 = vmatpush3.msra.mxu0 %v114_v8  ;;  %894 = vmatpush3.msra.mxu1 %v114_v8  ;;  %v93_v53 = vld [vmem:[#allocation2 + $0x190] sm:$0xff]  ;;  %v62_v54 = vld [vmem:[#allocation2 + $0x98] sm:$0xff]  ;;  %v63_v56 = vld [vmem:[#allocation2 + $0xa0] sm:$0xff] }
  0x2f   :  { %760 = vmatprep.subr.mxu0 %v113_v9  ;;  %879 = vmatprep.subr.mxu1 %v113_v9  ;;  %v94_v55 = vld [vmem:[#allocation2 + $0x198] sm:$0xff]  ;;  %v95_v57 = vld [vmem:[#allocation2 + $0x1a0] sm:$0xff]  ;;  %v64_v58 = vld [vmem:[#allocation2 + $0xa8] sm:$0xff] }
  0x30   :  { %761 = vmatpush3.msra.mxu0 %v113_v9  ;;  %895 = vmatpush3.msra.mxu1 %v113_v9  ;;  %v96_v59 = vld [vmem:[#allocation2 + $0x1a8] sm:$0xff]  ;;  %v65_v60 = vld [vmem:[#allocation2 + $0xb0] sm:$0xff]  ;;  %v66_v62 = vld [vmem:[#allocation2 + $0xb8] sm:$0xff] }
  0x31   :  { %762 = vmatprep.subr.mxu0 %v112_v10  ;;  %880 = vmatprep.subr.mxu1 %v112_v10  ;;  %v97_v61 = vld [vmem:[#allocation2 + $0x1b0] sm:$0xff]  ;;  %v98_v63 = vld [vmem:[#allocation2 + $0x1b8] sm:$0xff]  ;;  %v67_v0 = vld [vmem:[#allocation2 + $0xc0] sm:$0xff] }
  0x32   :  { %763 = vmatpush3.msra.mxu0 %v112_v10  ;;  %896 = vmatpush3.msra.mxu1 %v112_v10  ;;  %v99_v1 = vld [vmem:[#allocation2 + $0x1c0] sm:$0xff]  ;;  %v68_v2 = vld [vmem:[#allocation2 + $0xc8] sm:$0xff]  ;;  %v69_v4 = vld [vmem:[#allocation2 + $0xd0] sm:$0xff] }
  0x33   :  { %764 = vmatprep.subr.mxu0 %v111_v11  ;;  %881 = vmatprep.subr.mxu1 %v111_v11  ;;  %v100_v3 = vld [vmem:[#allocation2 + $0x1c8] sm:$0xff]  ;;  %v101_v5 = vld [vmem:[#allocation2 + $0x1d0] sm:$0xff]  ;;  %v70_v6 = vld [vmem:[#allocation2 + $0xd8] sm:$0xff] }
  0x34   :  { %765 = vmatpush3.msra.mxu0 %v111_v11  ;;  %897 = vmatpush3.msra.mxu1 %v111_v11  ;;  %v102_v7 = vld [vmem:[#allocation2 + $0x1d8] sm:$0xff]  ;;  %v71_v8 = vld [vmem:[#allocation2 + $0xe0] sm:$0xff]  ;;  %v72_v10 = vld [vmem:[#allocation2 + $0xe8] sm:$0xff] }
  0x35   :  { %766 = vmatprep.subr.mxu0 %v110_v12  ;;  %882 = vmatprep.subr.mxu1 %v110_v12  ;;  %v103_v9 = vld [vmem:[#allocation2 + $0x1e0] sm:$0xff]  ;;  %v104_v11 = vld [vmem:[#allocation2 + $0x1e8] sm:$0xff] }
  0x36   :  { %767 = vmatpush3.msra.mxu0 %v110_v12  ;;  %898 = vmatpush3.msra.mxu1 %v110_v12  ;;  %v73_v12 = vld [vmem:[#allocation2 + $0xf0] sm:$0xff] }
  0x37   :  { %768 = vmatprep.subr.mxu0 %v109_v13  ;;  %883 = vmatprep.subr.mxu1 %v109_v13 }
  0x38   :  { %769 = vmatpush3.msra.mxu0 %v109_v13  ;;  %899 = vmatpush3.msra.mxu1 %v109_v13  ;;  %v105_v13 = vld [vmem:[#allocation2 + $0x1f0] sm:$0xff] }
  0x39   :  { %770 = vmatprep.subr.mxu0 %v108_v14  ;;  %884 = vmatprep.subr.mxu1 %v108_v14 }
  0x3a   :  { %771 = vmatpush3.msra.mxu0 %v108_v14  ;;  %900 = vmatpush3.msra.mxu1 %v108_v14  ;;  %v74_v14 = vld [vmem:[#allocation2 + $0xf8] sm:$0xff] }
  0x3b   :  { %772 = vmatprep.subr.mxu0 %v107_v15  ;;  %885 = vmatprep.subr.mxu1 %v107_v15 }
  0x3c   :  { %773 = vmatpush3.msra.mxu0 %v107_v15  ;;  %901 = vmatpush3.msra.mxu1 %v107_v15  ;;  %v106_v15 = vld [vmem:[#allocation2 + $0x1f8] sm:$0xff] }
  0x3d   :  { %774 = vmatprep.mubr.f32.mxu0 %v43_v16  ;;  %822 = vmatprep.mubr.f32.mxu1 %v75_v17  ;;  %v1013_v16 = vld [vmem:[%s1087_s2] ss:$0 sm:$0xff]  ;;  %s977_s2 = smov [#allocation7]  }
  0x3e   :  { %775 = vmatmul.mubr.f32.vlgmr.msra.gmra.mxu0 %v44_v18  ;;  %823 = vmatmul.mubr.f32.vlgmr.msra.gmra.mxu1 %v76_v19  ;;  %s648_s24 = sshll.u32 %s977_s2, 4  ;;  %s649_s24 = int_to_ptr.vmem [resolvable:$true] %s648_s24 }
  0x3f   :  { %777 = vmatprep.mubr.f32.mxu0 %v45_v20  ;;  %825 = vmatprep.mubr.f32.mxu1 %v77_v21  ;;  %s947_s25 = scalar_lea.vmem %s649_s24, 8192  ;;  %p952_p11 = scmp.lt.s32.totalorder %s649_s24, %s649_s24 }
  0x40   :  { %p948_p10 = scmp.ne.s32.totalorder %s649_s24, %s947_s25  ;;  %p953_p12 = scmp.lt.s32.totalorder %s947_s25, %s947_s25 }
  0x42   :  { %778 = vmatmul.mubr.f32.gmra.mxu0 %v46_v22  ;;  %826 = vmatmul.mubr.f32.gmra.mxu1 %v78_v23  ;;  %p954_p13 = por %p953_p12, %p952_p11 }
  0x43   :  { %780 = vmatprep.mubr.f32.mxu0 %v47_v24  ;;  %828 = vmatprep.mubr.f32.mxu1 %v79_v25 }
  0x44   :  { %p955_p0 = pnand %p954_p13, %p948_p10 }
  0x46   :  { %781 = vmatmul.mubr.f32.gmra.mxu0 %v48_v26  ;;  %829 = vmatmul.mubr.f32.gmra.mxu1 %v80_v27 }
  0x47   :  { %783 = vmatprep.mubr.f32.mxu0 %v49_v28  ;;  %831 = vmatprep.mubr.f32.mxu1 %v81_v29 }
  0x4a   :  { %784 = vmatmul.mubr.f32.gmra.mxu0 %v50_v30  ;;  %832 = vmatmul.mubr.f32.gmra.mxu1 %v82_v31 }
  0x4b   :  { %786 = vmatprep.mubr.f32.mxu0 %v51_v32  ;;  %834 = vmatprep.mubr.f32.mxu1 %v83_v33 }
  0x4e   :  { %787 = vmatmul.mubr.f32.gmra.mxu0 %v52_v34  ;;  %835 = vmatmul.mubr.f32.gmra.mxu1 %v84_v35 }
  0x4f   :  { %789 = vmatprep.mubr.f32.mxu0 %v53_v36  ;;  %837 = vmatprep.mubr.f32.mxu1 %v85_v37 }
  0x52   :  { %790 = vmatmul.mubr.f32.gmra.mxu0 %v54_v38  ;;  %838 = vmatmul.mubr.f32.gmra.mxu1 %v86_v39 }
  0x53   :  { %792 = vmatprep.mubr.f32.mxu0 %v55_v40  ;;  %840 = vmatprep.mubr.f32.mxu1 %v87_v41 }
  0x56   :  { %793 = vmatmul.mubr.f32.gmra.mxu0 %v56_v42  ;;  %841 = vmatmul.mubr.f32.gmra.mxu1 %v88_v43 }
  0x57   :  { %795 = vmatprep.mubr.f32.mxu0 %v57_v44  ;;  %843 = vmatprep.mubr.f32.mxu1 %v89_v45 }
  0x5a   :  { %796 = vmatmul.mubr.f32.gmra.mxu0 %v58_v46  ;;  %844 = vmatmul.mubr.f32.gmra.mxu1 %v90_v47 }
  0x5b   :  { %798 = vmatprep.mubr.f32.mxu0 %v59_v48  ;;  %846 = vmatprep.mubr.f32.mxu1 %v91_v49 }
  0x5e   :  { %799 = vmatmul.mubr.f32.gmra.mxu0 %v60_v50  ;;  %847 = vmatmul.mubr.f32.gmra.mxu1 %v92_v51 }
  0x5f   :  { %801 = vmatprep.mubr.f32.mxu0 %v61_v52  ;;  %849 = vmatprep.mubr.f32.mxu1 %v93_v53 }
  0x62   :  { %802 = vmatmul.mubr.f32.gmra.mxu0 %v62_v54  ;;  %850 = vmatmul.mubr.f32.gmra.mxu1 %v94_v55 }
  0x63   :  { %804 = vmatprep.mubr.f32.mxu0 %v63_v56  ;;  %852 = vmatprep.mubr.f32.mxu1 %v95_v57 }
  0x66   :  { %805 = vmatmul.mubr.f32.gmra.mxu0 %v64_v58  ;;  %853 = vmatmul.mubr.f32.gmra.mxu1 %v96_v59 }
  0x67   :  { %807 = vmatprep.mubr.f32.mxu0 %v65_v60  ;;  %855 = vmatprep.mubr.f32.mxu1 %v97_v61 }
  0x6a   :  { %808 = vmatmul.mubr.f32.gmra.mxu0 %v66_v62  ;;  %856 = vmatmul.mubr.f32.gmra.mxu1 %v98_v63 }
  0x6b   :  { %810 = vmatprep.mubr.f32.mxu0 %v67_v0  ;;  %858 = vmatprep.mubr.f32.mxu1 %v99_v1 }
  0x6e   :  { %811 = vmatmul.mubr.f32.gmra.mxu0 %v68_v2  ;;  %859 = vmatmul.mubr.f32.gmra.mxu1 %v100_v3 }
  0x6f   :  { %813 = vmatprep.mubr.f32.mxu0 %v69_v4  ;;  %861 = vmatprep.mubr.f32.mxu1 %v101_v5 }
  0x72   :  { %814 = vmatmul.mubr.f32.gmra.mxu0 %v70_v6  ;;  %862 = vmatmul.mubr.f32.gmra.mxu1 %v102_v7 }
  0x73   :  { %816 = vmatprep.mubr.f32.mxu0 %v71_v8  ;;  %864 = vmatprep.mubr.f32.mxu1 %v103_v9 }
  0x76   :  { %817 = vmatmul.mubr.f32.gmra.mxu0 %v72_v10  ;;  %865 = vmatmul.mubr.f32.gmra.mxu1 %v104_v11 }
  0x77   :  { %819 = vmatprep.mubr.f32.mxu0 %v73_v12  ;;  %867 = vmatprep.mubr.f32.mxu1 %v105_v13 }
  0x7a   :  { %820 = vmatmul.mubr.f32.gmra.mxu0 %v74_v14  ;;  %868 = vmatmul.mubr.f32.gmra.mxu1 %v106_v15 }
  0xfe   :  { %v776_v17 = vpop.f32.mrf.mxu0  ;;  %v824_v18 = vpop.f32.mrf.mxu1 }
  0xff   :  { %v202_v19 = vadd.f32 %v776_v17, %v1013_v16  ;;  %v362_v20 = vadd.f32 %v824_v18, %v1013_v16 }
 0x100   :  { %v196_v21 = vpop.f32.mrf.mxu0  ;;  %v356_v22 = vpop.f32.mrf.mxu1 }
 0x101   :  { %v516_v23 = vmax.f32 %v202_v19, 0.0  ;;  %v548_v24 = vmax.f32 %v362_v20, 0.0  ;;  %v197_v25 = vadd.f32 %v1013_v16, %v196_v21  ;;  %v357_v26 = vadd.f32 %v1013_v16, %v356_v22 }
 0x102   :  { %v779_v27 = vpop.f32.mrf.mxu0  ;;  %v827_v28 = vpop.f32.mrf.mxu1 }
 0x103   :  { %580 = vst [vmem:[#allocation7 + $0x8] sm:$0xff] %v516_v23  ;;  %612 = vst [vmem:[#allocation7 + $0x108] sm:$0xff] %v548_v24  ;;  %v515_v29 = vmax.f32 %v197_v25, 0.0  ;;  %v547_v30 = vmax.f32 %v357_v26, 0.0  ;;  %v212_v31 = vadd.f32 %v779_v27, %v1013_v16  ;;  %v372_v32 = vadd.f32 %v827_v28, %v1013_v16 }
 0x104   :  { %v206_v33 = vpop.f32.mrf.mxu0  ;;  %v366_v34 = vpop.f32.mrf.mxu1 }
 0x105   :  { %579 = vst [vmem:[#allocation7] sm:$0xff] %v515_v29  ;;  %611 = vst [vmem:[#allocation7 + $0x100] sm:$0xff] %v547_v30  ;;  %v518_v35 = vmax.f32 %v212_v31, 0.0  ;;  %v550_v36 = vmax.f32 %v372_v32, 0.0  ;;  %v207_v37 = vadd.f32 %v1013_v16, %v206_v33  ;;  %v367_v38 = vadd.f32 %v1013_v16, %v366_v34 }
 0x106   :  { %v782_v39 = vpop.f32.mrf.mxu0  ;;  %v830_v40 = vpop.f32.mrf.mxu1 }
 0x107   :  { %582 = vst [vmem:[#allocation7 + $0x18] sm:$0xff] %v518_v35  ;;  %614 = vst [vmem:[#allocation7 + $0x118] sm:$0xff] %v550_v36  ;;  %v517_v41 = vmax.f32 %v207_v37, 0.0  ;;  %v549_v42 = vmax.f32 %v367_v38, 0.0  ;;  %v222_v43 = vadd.f32 %v782_v39, %v1013_v16  ;;  %v382_v44 = vadd.f32 %v830_v40, %v1013_v16 }
 0x108   :  { %v216_v45 = vpop.f32.mrf.mxu0  ;;  %v376_v46 = vpop.f32.mrf.mxu1 }
 0x109   :  { %581 = vst [vmem:[#allocation7 + $0x10] sm:$0xff] %v517_v41  ;;  %613 = vst [vmem:[#allocation7 + $0x110] sm:$0xff] %v549_v42  ;;  %v520_v47 = vmax.f32 %v222_v43, 0.0  ;;  %v552_v48 = vmax.f32 %v382_v44, 0.0  ;;  %v217_v49 = vadd.f32 %v1013_v16, %v216_v45  ;;  %v377_v50 = vadd.f32 %v1013_v16, %v376_v46 }
 0x10a   :  { %v785_v51 = vpop.f32.mrf.mxu0  ;;  %v833_v52 = vpop.f32.mrf.mxu1 }
 0x10b   :  { %584 = vst [vmem:[#allocation7 + $0x28] sm:$0xff] %v520_v47  ;;  %616 = vst [vmem:[#allocation7 + $0x128] sm:$0xff] %v552_v48  ;;  %v519_v53 = vmax.f32 %v217_v49, 0.0  ;;  %v551_v54 = vmax.f32 %v377_v50, 0.0  ;;  %v232_v55 = vadd.f32 %v785_v51, %v1013_v16  ;;  %v392_v56 = vadd.f32 %v833_v52, %v1013_v16 }
 0x10c   :  { %v226_v57 = vpop.f32.mrf.mxu0  ;;  %v386_v58 = vpop.f32.mrf.mxu1 }
 0x10d   :  { %583 = vst [vmem:[#allocation7 + $0x20] sm:$0xff] %v519_v53  ;;  %615 = vst [vmem:[#allocation7 + $0x120] sm:$0xff] %v551_v54  ;;  %v522_v59 = vmax.f32 %v232_v55, 0.0  ;;  %v554_v60 = vmax.f32 %v392_v56, 0.0  ;;  %v227_v61 = vadd.f32 %v1013_v16, %v226_v57  ;;  %v387_v62 = vadd.f32 %v1013_v16, %v386_v58 }
 0x10e   :  { %v788_v63 = vpop.f32.mrf.mxu0  ;;  %v836_v0 = vpop.f32.mrf.mxu1 }
 0x10f   :  { %586 = vst [vmem:[#allocation7 + $0x38] sm:$0xff] %v522_v59  ;;  %618 = vst [vmem:[#allocation7 + $0x138] sm:$0xff] %v554_v60  ;;  %v521_v1 = vmax.f32 %v227_v61, 0.0  ;;  %v553_v2 = vmax.f32 %v387_v62, 0.0  ;;  %v242_v3 = vadd.f32 %v788_v63, %v1013_v16  ;;  %v402_v4 = vadd.f32 %v836_v0, %v1013_v16 }
 0x110   :  { %v236_v5 = vpop.f32.mrf.mxu0  ;;  %v396_v6 = vpop.f32.mrf.mxu1 }
 0x111   :  { %585 = vst [vmem:[#allocation7 + $0x30] sm:$0xff] %v521_v1  ;;  %617 = vst [vmem:[#allocation7 + $0x130] sm:$0xff] %v553_v2  ;;  %v524_v7 = vmax.f32 %v242_v3, 0.0  ;;  %v556_v8 = vmax.f32 %v402_v4, 0.0  ;;  %v237_v9 = vadd.f32 %v1013_v16, %v236_v5  ;;  %v397_v10 = vadd.f32 %v1013_v16, %v396_v6 }
 0x112   :  { %v791_v11 = vpop.f32.mrf.mxu0  ;;  %v839_v12 = vpop.f32.mrf.mxu1 }
 0x113   :  { %588 = vst [vmem:[#allocation7 + $0x48] sm:$0xff] %v524_v7  ;;  %620 = vst [vmem:[#allocation7 + $0x148] sm:$0xff] %v556_v8  ;;  %v523_v13 = vmax.f32 %v237_v9, 0.0  ;;  %v555_v14 = vmax.f32 %v397_v10, 0.0  ;;  %v252_v15 = vadd.f32 %v791_v11, %v1013_v16  ;;  %v412_v17 = vadd.f32 %v839_v12, %v1013_v16 }
 0x114   :  { %v246_v18 = vpop.f32.mrf.mxu0  ;;  %v406_v19 = vpop.f32.mrf.mxu1 }
 0x115   :  { %587 = vst [vmem:[#allocation7 + $0x40] sm:$0xff] %v523_v13  ;;  %619 = vst [vmem:[#allocation7 + $0x140] sm:$0xff] %v555_v14  ;;  %v526_v20 = vmax.f32 %v252_v15, 0.0  ;;  %v558_v21 = vmax.f32 %v412_v17, 0.0  ;;  %v247_v22 = vadd.f32 %v1013_v16, %v246_v18  ;;  %v407_v23 = vadd.f32 %v1013_v16, %v406_v19 }
 0x116   :  { %v794_v24 = vpop.f32.mrf.mxu0  ;;  %v842_v25 = vpop.f32.mrf.mxu1 }
 0x117   :  { %590 = vst [vmem:[#allocation7 + $0x58] sm:$0xff] %v526_v20  ;;  %622 = vst [vmem:[#allocation7 + $0x158] sm:$0xff] %v558_v21  ;;  %v525_v26 = vmax.f32 %v247_v22, 0.0  ;;  %v557_v27 = vmax.f32 %v407_v23, 0.0  ;;  %v262_v28 = vadd.f32 %v794_v24, %v1013_v16  ;;  %v422_v29 = vadd.f32 %v842_v25, %v1013_v16 }
 0x118   :  { %v256_v30 = vpop.f32.mrf.mxu0  ;;  %v416_v31 = vpop.f32.mrf.mxu1 }
 0x119   :  { %589 = vst [vmem:[#allocation7 + $0x50] sm:$0xff] %v525_v26  ;;  %621 = vst [vmem:[#allocation7 + $0x150] sm:$0xff] %v557_v27  ;;  %v528_v32 = vmax.f32 %v262_v28, 0.0  ;;  %v560_v33 = vmax.f32 %v422_v29, 0.0  ;;  %v257_v34 = vadd.f32 %v1013_v16, %v256_v30  ;;  %v417_v35 = vadd.f32 %v1013_v16, %v416_v31 }
 0x11a   :  { %v797_v36 = vpop.f32.mrf.mxu0  ;;  %v845_v37 = vpop.f32.mrf.mxu1 }
 0x11b   :  { %592 = vst [vmem:[#allocation7 + $0x68] sm:$0xff] %v528_v32  ;;  %624 = vst [vmem:[#allocation7 + $0x168] sm:$0xff] %v560_v33  ;;  %v527_v38 = vmax.f32 %v257_v34, 0.0  ;;  %v559_v39 = vmax.f32 %v417_v35, 0.0  ;;  %v272_v40 = vadd.f32 %v797_v36, %v1013_v16  ;;  %v432_v41 = vadd.f32 %v845_v37, %v1013_v16 }
 0x11c   :  { %v266_v42 = vpop.f32.mrf.mxu0  ;;  %v426_v43 = vpop.f32.mrf.mxu1 }
 0x11d   :  { %591 = vst [vmem:[#allocation7 + $0x60] sm:$0xff] %v527_v38  ;;  %623 = vst [vmem:[#allocation7 + $0x160] sm:$0xff] %v559_v39  ;;  %v530_v44 = vmax.f32 %v272_v40, 0.0  ;;  %v562_v45 = vmax.f32 %v432_v41, 0.0  ;;  %v267_v46 = vadd.f32 %v1013_v16, %v266_v42  ;;  %v427_v47 = vadd.f32 %v1013_v16, %v426_v43 }
 0x11e   :  { %v800_v48 = vpop.f32.mrf.mxu0  ;;  %v848_v49 = vpop.f32.mrf.mxu1 }
 0x11f   :  { %594 = vst [vmem:[#allocation7 + $0x78] sm:$0xff] %v530_v44  ;;  %626 = vst [vmem:[#allocation7 + $0x178] sm:$0xff] %v562_v45  ;;  %v529_v50 = vmax.f32 %v267_v46, 0.0  ;;  %v561_v51 = vmax.f32 %v427_v47, 0.0  ;;  %v282_v52 = vadd.f32 %v800_v48, %v1013_v16  ;;  %v442_v53 = vadd.f32 %v848_v49, %v1013_v16 }
 0x120   :  { %v276_v54 = vpop.f32.mrf.mxu0  ;;  %v436_v55 = vpop.f32.mrf.mxu1 }
 0x121   :  { %593 = vst [vmem:[#allocation7 + $0x70] sm:$0xff] %v529_v50  ;;  %625 = vst [vmem:[#allocation7 + $0x170] sm:$0xff] %v561_v51  ;;  %v532_v56 = vmax.f32 %v282_v52, 0.0  ;;  %v564_v57 = vmax.f32 %v442_v53, 0.0  ;;  %v277_v58 = vadd.f32 %v1013_v16, %v276_v54  ;;  %v437_v59 = vadd.f32 %v1013_v16, %v436_v55 }
 0x122   :  { %v803_v60 = vpop.f32.mrf.mxu0  ;;  %v851_v61 = vpop.f32.mrf.mxu1 }
 0x123   :  { %596 = vst [vmem:[#allocation7 + $0x88] sm:$0xff] %v532_v56  ;;  %628 = vst [vmem:[#allocation7 + $0x188] sm:$0xff] %v564_v57  ;;  %v531_v62 = vmax.f32 %v277_v58, 0.0  ;;  %v563_v63 = vmax.f32 %v437_v59, 0.0  ;;  %v292_v0 = vadd.f32 %v803_v60, %v1013_v16  ;;  %v452_v1 = vadd.f32 %v851_v61, %v1013_v16 }
 0x124   :  { %v286_v2 = vpop.f32.mrf.mxu0  ;;  %v446_v3 = vpop.f32.mrf.mxu1 }
 0x125   :  { %595 = vst [vmem:[#allocation7 + $0x80] sm:$0xff] %v531_v62  ;;  %627 = vst [vmem:[#allocation7 + $0x180] sm:$0xff] %v563_v63  ;;  %v534_v4 = vmax.f32 %v292_v0, 0.0  ;;  %v566_v5 = vmax.f32 %v452_v1, 0.0  ;;  %v287_v6 = vadd.f32 %v1013_v16, %v286_v2  ;;  %v447_v7 = vadd.f32 %v1013_v16, %v446_v3 }
 0x126   :  { %v806_v8 = vpop.f32.mrf.mxu0  ;;  %v854_v9 = vpop.f32.mrf.mxu1 }
 0x127   :  { %598 = vst [vmem:[#allocation7 + $0x98] sm:$0xff] %v534_v4  ;;  %630 = vst [vmem:[#allocation7 + $0x198] sm:$0xff] %v566_v5  ;;  %v533_v10 = vmax.f32 %v287_v6, 0.0  ;;  %v565_v11 = vmax.f32 %v447_v7, 0.0  ;;  %v302_v12 = vadd.f32 %v806_v8, %v1013_v16  ;;  %v462_v13 = vadd.f32 %v854_v9, %v1013_v16 }
 0x128   :  { %v296_v14 = vpop.f32.mrf.mxu0  ;;  %v456_v15 = vpop.f32.mrf.mxu1 }
 0x129   :  { %597 = vst [vmem:[#allocation7 + $0x90] sm:$0xff] %v533_v10  ;;  %629 = vst [vmem:[#allocation7 + $0x190] sm:$0xff] %v565_v11  ;;  %v536_v17 = vmax.f32 %v302_v12, 0.0  ;;  %v568_v18 = vmax.f32 %v462_v13, 0.0  ;;  %v297_v19 = vadd.f32 %v1013_v16, %v296_v14  ;;  %v457_v20 = vadd.f32 %v1013_v16, %v456_v15 }
 0x12a   :  { %v809_v21 = vpop.f32.mrf.mxu0  ;;  %v857_v22 = vpop.f32.mrf.mxu1 }
 0x12b   :  { %600 = vst [vmem:[#allocation7 + $0xa8] sm:$0xff] %v536_v17  ;;  %632 = vst [vmem:[#allocation7 + $0x1a8] sm:$0xff] %v568_v18  ;;  %v535_v23 = vmax.f32 %v297_v19, 0.0  ;;  %v567_v24 = vmax.f32 %v457_v20, 0.0  ;;  %v312_v25 = vadd.f32 %v809_v21, %v1013_v16  ;;  %v472_v26 = vadd.f32 %v857_v22, %v1013_v16 }
 0x12c   :  { %v306_v27 = vpop.f32.mrf.mxu0  ;;  %v466_v28 = vpop.f32.mrf.mxu1 }
 0x12d   :  { %599 = vst [vmem:[#allocation7 + $0xa0] sm:$0xff] %v535_v23  ;;  %631 = vst [vmem:[#allocation7 + $0x1a0] sm:$0xff] %v567_v24  ;;  %v538_v29 = vmax.f32 %v312_v25, 0.0  ;;  %v570_v30 = vmax.f32 %v472_v26, 0.0  ;;  %v307_v31 = vadd.f32 %v1013_v16, %v306_v27  ;;  %v467_v32 = vadd.f32 %v1013_v16, %v466_v28 }
 0x12e   :  { %v812_v33 = vpop.f32.mrf.mxu0  ;;  %v860_v34 = vpop.f32.mrf.mxu1 }
 0x12f   :  { %602 = vst [vmem:[#allocation7 + $0xb8] sm:$0xff] %v538_v29  ;;  %634 = vst [vmem:[#allocation7 + $0x1b8] sm:$0xff] %v570_v30  ;;  %v537_v35 = vmax.f32 %v307_v31, 0.0  ;;  %v569_v36 = vmax.f32 %v467_v32, 0.0  ;;  %v322_v37 = vadd.f32 %v812_v33, %v1013_v16  ;;  %v482_v38 = vadd.f32 %v860_v34, %v1013_v16 }
 0x130   :  { %v316_v39 = vpop.f32.mrf.mxu0  ;;  %v476_v40 = vpop.f32.mrf.mxu1 }
 0x131   :  { %601 = vst [vmem:[#allocation7 + $0xb0] sm:$0xff] %v537_v35  ;;  %633 = vst [vmem:[#allocation7 + $0x1b0] sm:$0xff] %v569_v36  ;;  %v540_v41 = vmax.f32 %v322_v37, 0.0  ;;  %v572_v42 = vmax.f32 %v482_v38, 0.0  ;;  %v317_v43 = vadd.f32 %v1013_v16, %v316_v39  ;;  %v477_v44 = vadd.f32 %v1013_v16, %v476_v40 }
 0x132   :  { %v815_v45 = vpop.f32.mrf.mxu0  ;;  %v863_v46 = vpop.f32.mrf.mxu1 }
 0x133   :  { %604 = vst [vmem:[#allocation7 + $0xc8] sm:$0xff] %v540_v41  ;;  %636 = vst [vmem:[#allocation7 + $0x1c8] sm:$0xff] %v572_v42  ;;  %v539_v47 = vmax.f32 %v317_v43, 0.0  ;;  %v571_v48 = vmax.f32 %v477_v44, 0.0  ;;  %v332_v49 = vadd.f32 %v815_v45, %v1013_v16  ;;  %v492_v50 = vadd.f32 %v863_v46, %v1013_v16 }
 0x134   :  { %v326_v51 = vpop.f32.mrf.mxu0  ;;  %v486_v52 = vpop.f32.mrf.mxu1 }
 0x135   :  { %603 = vst [vmem:[#allocation7 + $0xc0] sm:$0xff] %v539_v47  ;;  %635 = vst [vmem:[#allocation7 + $0x1c0] sm:$0xff] %v571_v48  ;;  %v542_v53 = vmax.f32 %v332_v49, 0.0  ;;  %v574_v54 = vmax.f32 %v492_v50, 0.0  ;;  %v327_v55 = vadd.f32 %v1013_v16, %v326_v51  ;;  %v487_v56 = vadd.f32 %v1013_v16, %v486_v52 }
 0x136   :  { %v818_v57 = vpop.f32.mrf.mxu0  ;;  %v866_v58 = vpop.f32.mrf.mxu1 }
 0x137   :  { %606 = vst [vmem:[#allocation7 + $0xd8] sm:$0xff] %v542_v53  ;;  %638 = vst [vmem:[#allocation7 + $0x1d8] sm:$0xff] %v574_v54  ;;  %v541_v59 = vmax.f32 %v327_v55, 0.0  ;;  %v573_v60 = vmax.f32 %v487_v56, 0.0  ;;  %v342_v61 = vadd.f32 %v818_v57, %v1013_v16  ;;  %v502_v62 = vadd.f32 %v866_v58, %v1013_v16 }
 0x138   :  { %v336_v63 = vpop.f32.mrf.mxu0  ;;  %v496_v0 = vpop.f32.mrf.mxu1 }
 0x139   :  { %605 = vst [vmem:[#allocation7 + $0xd0] sm:$0xff] %v541_v59  ;;  %637 = vst [vmem:[#allocation7 + $0x1d0] sm:$0xff] %v573_v60  ;;  %v544_v1 = vmax.f32 %v342_v61, 0.0  ;;  %v576_v2 = vmax.f32 %v502_v62, 0.0  ;;  %v337_v3 = vadd.f32 %v1013_v16, %v336_v63  ;;  %v497_v4 = vadd.f32 %v1013_v16, %v496_v0 }
 0x13a   :  { %v821_v5 = vpop.f32.mrf.mxu0  ;;  %v869_v6 = vpop.f32.mrf.mxu1 }
 0x13b   :  { %608 = vst [vmem:[#allocation7 + $0xe8] sm:$0xff] %v544_v1  ;;  %640 = vst [vmem:[#allocation7 + $0x1e8] sm:$0xff] %v576_v2  ;;  %v543_v7 = vmax.f32 %v337_v3, 0.0  ;;  %v575_v8 = vmax.f32 %v497_v4, 0.0  ;;  %v352_v9 = vadd.f32 %v821_v5, %v1013_v16  ;;  %v512_v10 = vadd.f32 %v869_v6, %v1013_v16 }
 0x13c   :  { %v346_v11 = vpop.f32.mrf.mxu0  ;;  %v506_v12 = vpop.f32.mrf.mxu1 }
 0x13d   :  { %607 = vst [vmem:[#allocation7 + $0xe0] sm:$0xff] %v543_v7  ;;  %639 = vst [vmem:[#allocation7 + $0x1e0] sm:$0xff] %v575_v8  ;;  %v546_v13 = vmax.f32 %v352_v9, 0.0  ;;  %v578_v14 = vmax.f32 %v512_v10, 0.0  ;;  %v347_v15 = vadd.f32 %v1013_v16, %v346_v11  ;;  %v507_v17 = vadd.f32 %v1013_v16, %v506_v12 }
 0x13f   :  { %610 = vst [vmem:[#allocation7 + $0xf8] sm:$0xff] %v546_v13  ;;  %642 = vst [vmem:[#allocation7 + $0x1f8] sm:$0xff] %v578_v14  ;;  %v545_v18 = vmax.f32 %v347_v15, 0.0  ;;  %v577_v19 = vmax.f32 %v507_v17, 0.0 }
 0x141   :  { %609 = vst [vmem:[#allocation7 + $0xf0] sm:$0xff] %v545_v18  ;;  %641 = vst [vmem:[#allocation7 + $0x1f0] sm:$0xff] %v577_v19 }
 0x142   :  { %958 = shalt.err (!%p955_p0)
}
 0x143   :  { %654 = dma.vmem_to_hbm [thread:$0]  %s649_s24, 8192, %s1088_s3, [#allocation4], %s974_s15, %s974_s15, %s975_s16  }
 0x144   :  { %971 = dma.done.wait [#allocation4], 8192  }
 0x145   :  { %972 = vsyncadd [#allocation4], 4294959104 }
 0x146   :  { %658 = vsyncpa [#allocation3], 1 }
 0x147   :  { %659 = vsyncpa [#allocation6], 1 }
 0x148   :  { %660 = vsyncpa [#allocation4], 1 }

</bundles_post_ra>
